<compile_context>
chip_gen: v7x
topology: tpu7x:2x2x1
jax: 0.10.0
libtpu: 0.0.40
codegen_flags: <defaults>
</compile_context>

<pallas_src>
import functools

import jax
import jax.numpy as jnp
from jax.experimental import pallas as pl
from jax.experimental.pallas import tpu as pltpu


_LANE = 128           # TPU lane width
_ROW_TILE_MAX = 256   # rows (N*C) per block; multiple of 8
_COL_TILE_MAX = 2048  # spatial columns per block; multiple of 128 (≥85% of HBM roofline)


def _vmem_capacity_bytes():
    try:
        return int(pltpu.get_tpu_info().vmem_capacity_bytes)
    except Exception:
        return 64 * 1024 * 1024  # conservative fallback (v7x per-TensorCore VMEM)


def _dice_kernel(p_ref, t_ref, out_ref, num_acc, den_acc, *,
                 smooth, hw, col_tile, chunks, need_col_mask):
    """One row-block of dice terms, accumulated over the spatial grid axis."""
    k = pl.program_id(1)  # spatial (reduction) axis — last grid axis, "arbitrary"

    @pl.when(k == 0)
    def _init():
        num_acc[...] = jnp.zeros_like(num_acc)
        den_acc[...] = jnp.zeros_like(den_acc)

    col0 = k * col_tile
    # Static, fully-unrolled 128-lane chunk loop: all accumulation is VPU-only;
    # the single cross-lane reduce happens once in the epilogue below.
    for off, w in chunks:
        p = jax.nn.sigmoid(p_ref[:, off:off + w].astype(jnp.float32))
        t = t_ref[:, off:off + w].astype(jnp.float32)
        if need_col_mask:
            # Mask columns past H*W (last spatial block only has garbage there).
            idx = jax.lax.broadcasted_iota(jnp.int32, p.shape, 1) + (col0 + off)
            valid = idx < hw
            p = jnp.where(valid, p, 0.0)
            t = jnp.where(valid, t, 0.0)
        num_acc[:, :w] += p * t
        den_acc[:, :w] += p * p + t * t

    @pl.when(k == pl.num_programs(1) - 1)
    def _finalize():
        num = jnp.sum(num_acc[...], axis=1, keepdims=True) + smooth
        den = jnp.sum(den_acc[...], axis=1, keepdims=True) + smooth
        out_ref[...] = 1.0 - num / den


def dice_loss(predict, target, *, smooth=1.0):
    """DiceLoss.forward with logit='sigmoid', weight=None, ignore_index=None,
    and BinaryDiceLoss defaults (smooth=1, p=2, reduction='mean').

    predict/target may be f32 or bf16 (cast to f32 inside the kernel)."""
    assert predict.shape == target.shape, "predict & target shape do not match"
    N, C = predict.shape[0], predict.shape[1]
    nc = N * C

    p2 = predict.reshape(nc, -1)
    t2 = target.reshape(nc, -1)
    hw = p2.shape[1]

    # ---- row (N*C) blocking: "parallel" grid axis (megacore on v7x) ----
    row_tile = nc if nc <= _ROW_TILE_MAX else _ROW_TILE_MAX
    n_row = pl.cdiv(nc, row_tile)

    # ---- spatial blocking: reduction axis, sized from the VMEM budget ----
    vmem_bytes = _vmem_capacity_bytes()
    budget = int(vmem_bytes * 0.4)  # headroom for scratch / compiler temporaries
    bytes_per_col = 2 * row_tile * (p2.dtype.itemsize + t2.dtype.itemsize)  # 2x: double buffering
    col_cap = max(_LANE, min(_COL_TILE_MAX,
                             (budget // max(bytes_per_col, 1)) // _LANE * _LANE))

    if hw <= col_cap:
        col_tile = hw             # one exact column block — no masking needed
    else:
        col_tile = col_cap        # multiple of 128; ragged tail masked in-kernel
    n_col = pl.cdiv(hw, col_tile)
    need_col_mask = (n_col * col_tile != hw)

    # Static per-block chunk layout (128-lane chunks; last one may be ragged).
    chunks, off = [], 0
    while off < col_tile:
        w = min(_LANE, col_tile - off)
        chunks.append((off, w))
        off += w
    chunks = tuple(chunks)
    acc_w = min(_LANE, col_tile)

    kernel = functools.partial(
        _dice_kernel, smooth=float(smooth), hw=hw, col_tile=col_tile,
        chunks=chunks, need_col_mask=need_col_mask)

    # Working set: double-buffered input tiles + accumulators + output rows.
    ws = (2 * row_tile * col_tile * (p2.dtype.itemsize + t2.dtype.itemsize)
          + 2 * row_tile * acc_w * 4 + 2 * row_tile * 4)
    vmem_limit = int(min(0.9 * vmem_bytes, max(32 * 1024 * 1024, 4 * ws)))

    cost = pl.CostEstimate(
        flops=int(6 * nc * hw),
        transcendentals=int(nc * hw),
        bytes_accessed=int(nc * hw * (p2.dtype.itemsize + t2.dtype.itemsize) + nc * 4),
    )

    per_row = pl.pallas_call(
        kernel,
        out_shape=jax.ShapeDtypeStruct((nc, 1), jnp.float32),
        grid_spec=pltpu.PrefetchScalarGridSpec(
            num_scalar_prefetch=0,
            grid=(n_row, n_col),
            in_specs=[
                pl.BlockSpec((row_tile, col_tile), lambda r, k: (r, k)),
                pl.BlockSpec((row_tile, col_tile), lambda r, k: (r, k)),
            ],
            out_specs=pl.BlockSpec((row_tile, 1), lambda r, k: (r, 0)),
            scratch_shapes=[
                pltpu.VMEM((row_tile, acc_w), jnp.float32),
                pltpu.VMEM((row_tile, acc_w), jnp.float32),
            ],
        ),
        compiler_params=pltpu.CompilerParams(
            dimension_semantics=("parallel", "arbitrary"),
            vmem_limit_bytes=vmem_limit,
        ),
        cost_estimate=cost,
    )(p2, t2)

    # reduction='mean' over batch per class, summed over classes, / C
    #   == mean over all N*C rows.
    return jnp.sum(per_row) / float(nc)


def _reference_dice_loss(predict, target, smooth=1.0):
    """Pure-JAX reference mirroring the PyTorch module semantics."""
    N, C = predict.shape[0], predict.shape[1]
    p = jax.nn.sigmoid(predict.astype(jnp.float32))
    t = target.astype(jnp.float32)
    total = 0.0
    for i in range(C):
        pi = p[:, i].reshape(N, -1)
        ti = t[:, i].reshape(N, -1)
        num = jnp.sum(pi * ti, axis=1) + smooth
        den = jnp.sum(pi ** 2 + ti ** 2, axis=1) + smooth
        total = total + jnp.mean(1.0 - num / den)
    return total / C


if __name__ == "__main__":
    key = jax.random.PRNGKey(0)
    k1, k2 = jax.random.split(key)

    N, C, H, W = 2, 4, 16, 16
    predict = jax.random.normal(k1, (N, C, H, W), dtype=jnp.float32)
    # one-hot-ish binary target
    target = (jax.random.uniform(k2, (N, C, H, W)) > 0.5).astype(jnp.float32)

    loss = dice_loss(predict, target)
    loss = jax.block_until_ready(loss)

    ref = _reference_dice_loss(predict, target)
    assert jnp.allclose(loss, ref, atol=1e-5, rtol=1e-5), (loss, ref)

    print("KERNEL_OK")
</pallas_src>

<mosaic_0001>
module attributes {stable_mosaic.version = 11 : i64} {
  func.func @_dice_kernel(%arg0: i32, %arg1: i32, %arg2: memref<8x256xf32, #tpu.memory_space<vmem>>, %arg3: memref<8x256xf32, #tpu.memory_space<vmem>>, %arg4: memref<8x1xf32, #tpu.memory_space<vmem>>, %arg5: memref<8x128xf32, #tpu.memory_space<vmem>>, %arg6: memref<8x128xf32, #tpu.memory_space<vmem>>) attributes {dimension_semantics = [#tpu.dimension_semantics<parallel>, #tpu.dimension_semantics<arbitrary>], iteration_bounds = array<i64: 1, 1>, scalar_prefetch = 0 : i64, scratch_operands = 2 : i64, tpu.core_type = #tpu.core_type<tc>, window_params = [{transform_indices = @transform_0, window_bounds = array<i64: 8, 256>}, {transform_indices = @transform_1, window_bounds = array<i64: 8, 256>}, {transform_indices = @transform_2, window_bounds = array<i64: 8, 1>}]} {
    %c0_i32 = arith.constant 0 : i32
    %0 = arith.cmpi eq, %arg1, %c0_i32 : i32
    %1 = arith.extui %0 : i1 to i32
    %c0_i32_0 = arith.constant 0 : i32
    %2 = arith.cmpi ne, %1, %c0_i32_0 : i32
    scf.if %2 {
      %cst_26 = arith.constant 0.000000e+00 : f32
      %40 = vector.broadcast %cst_26 : f32 to vector<8x128xf32>
      %c0_27 = arith.constant 0 : index
      %c0_28 = arith.constant 0 : index
      %41 = vector.load %arg5[%c0_27, %c0_28] : memref<8x128xf32, #tpu.memory_space<vmem>>, vector<8x128xf32>
      tpu.vector_store %arg5[%c0_27, %c0_28], %40 {strides = array<i32>} : memref<8x128xf32, #tpu.memory_space<vmem>>, vector<8x128xf32>,
      %cst_29 = arith.constant 0.000000e+00 : f32
      %42 = vector.broadcast %cst_29 : f32 to vector<8x128xf32>
      %c0_30 = arith.constant 0 : index
      %c0_31 = arith.constant 0 : index
      %43 = vector.load %arg6[%c0_30, %c0_31] : memref<8x128xf32, #tpu.memory_space<vmem>>, vector<8x128xf32>
      tpu.vector_store %arg6[%c0_30, %c0_31], %42 {strides = array<i32>} : memref<8x128xf32, #tpu.memory_space<vmem>>, vector<8x128xf32>,
    } else {
    }
    %c0 = arith.constant 0 : index
    %c0_1 = arith.constant 0 : index
    %3 = vector.load %arg2[%c0, %c0_1] : memref<8x256xf32, #tpu.memory_space<vmem>>, vector<8x128xf32>
    %4 = arith.negf %3 : vector<8x128xf32>
    %5 = math.exp %4 : vector<8x128xf32>
    %cst = arith.constant 1.000000e+00 : f32
    %6 = vector.broadcast %cst : f32 to vector<8x128xf32>
    %7 = arith.addf %6, %5 : vector<8x128xf32>
    %8 = arith.divf %6, %7 : vector<8x128xf32>
    %c0_2 = arith.constant 0 : index
    %c0_3 = arith.constant 0 : index
    %9 = vector.load %arg3[%c0_2, %c0_3] : memref<8x256xf32, #tpu.memory_space<vmem>>, vector<8x128xf32>
    %c0_4 = arith.constant 0 : index
    %c0_5 = arith.constant 0 : index
    %10 = vector.load %arg5[%c0_4, %c0_5] : memref<8x128xf32, #tpu.memory_space<vmem>>, vector<8x128xf32>
    %11 = arith.mulf %8, %9 : vector<8x128xf32>
    %12 = arith.addf %10, %11 : vector<8x128xf32>
    %c0_6 = arith.constant 0 : index
    %c0_7 = arith.constant 0 : index
    %13 = vector.load %arg5[%c0_6, %c0_7] : memref<8x128xf32, #tpu.memory_space<vmem>>, vector<8x128xf32>
    tpu.vector_store %arg5[%c0_6, %c0_7], %12 {strides = array<i32>} : memref<8x128xf32, #tpu.memory_space<vmem>>, vector<8x128xf32>,
    %c0_8 = arith.constant 0 : index
    %c0_9 = arith.constant 0 : index
    %14 = vector.load %arg6[%c0_8, %c0_9] : memref<8x128xf32, #tpu.memory_space<vmem>>, vector<8x128xf32>
    %15 = arith.mulf %8, %8 : vector<8x128xf32>
    %16 = arith.mulf %9, %9 : vector<8x128xf32>
    %17 = arith.addf %15, %16 : vector<8x128xf32>
    %18 = arith.addf %14, %17 : vector<8x128xf32>
    %c0_10 = arith.constant 0 : index
    %c0_11 = arith.constant 0 : index
    %19 = vector.load %arg6[%c0_10, %c0_11] : memref<8x128xf32, #tpu.memory_space<vmem>>, vector<8x128xf32>
    tpu.vector_store %arg6[%c0_10, %c0_11], %18 {strides = array<i32>} : memref<8x128xf32, #tpu.memory_space<vmem>>, vector<8x128xf32>,
    %c0_12 = arith.constant 0 : index
    %c128 = arith.constant 128 : index
    %20 = vector.load %arg2[%c0_12, %c128] : memref<8x256xf32, #tpu.memory_space<vmem>>, vector<8x128xf32>
    %21 = arith.negf %20 : vector<8x128xf32>
    %22 = math.exp %21 : vector<8x128xf32>
    %cst_13 = arith.constant 1.000000e+00 : f32
    %23 = vector.broadcast %cst_13 : f32 to vector<8x128xf32>
    %24 = arith.addf %23, %22 : vector<8x128xf32>
    %25 = arith.divf %23, %24 : vector<8x128xf32>
    %c0_14 = arith.constant 0 : index
    %c128_15 = arith.constant 128 : index
    %26 = vector.load %arg3[%c0_14, %c128_15] : memref<8x256xf32, #tpu.memory_space<vmem>>, vector<8x128xf32>
    %c0_16 = arith.constant 0 : index
    %c0_17 = arith.constant 0 : index
    %27 = vector.load %arg5[%c0_16, %c0_17] : memref<8x128xf32, #tpu.memory_space<vmem>>, vector<8x128xf32>
    %28 = arith.mulf %25, %26 : vector<8x128xf32>
    %29 = arith.addf %27, %28 : vector<8x128xf32>
    %c0_18 = arith.constant 0 : index
    %c0_19 = arith.constant 0 : index
    %30 = vector.load %arg5[%c0_18, %c0_19] : memref<8x128xf32, #tpu.memory_space<vmem>>, vector<8x128xf32>
    tpu.vector_store %arg5[%c0_18, %c0_19], %29 {strides = array<i32>} : memref<8x128xf32, #tpu.memory_space<vmem>>, vector<8x128xf32>,
    %c0_20 = arith.constant 0 : index
    %c0_21 = arith.constant 0 : index
    %31 = vector.load %arg6[%c0_20, %c0_21] : memref<8x128xf32, #tpu.memory_space<vmem>>, vector<8x128xf32>
    %32 = arith.mulf %25, %25 : vector<8x128xf32>
    %33 = arith.mulf %26, %26 : vector<8x128xf32>
    %34 = arith.addf %32, %33 : vector<8x128xf32>
    %35 = arith.addf %31, %34 : vector<8x128xf32>
    %c0_22 = arith.constant 0 : index
    %c0_23 = arith.constant 0 : index
    %36 = vector.load %arg6[%c0_22, %c0_23] : memref<8x128xf32, #tpu.memory_space<vmem>>, vector<8x128xf32>
    tpu.vector_store %arg6[%c0_22, %c0_23], %35 {strides = array<i32>} : memref<8x128xf32, #tpu.memory_space<vmem>>, vector<8x128xf32>,
    %c0_i32_24 = arith.constant 0 : i32
    %37 = arith.cmpi eq, %arg1, %c0_i32_24 : i32
    %38 = arith.extui %37 : i1 to i32
    %c0_i32_25 = arith.constant 0 : i32
    %39 = arith.cmpi ne, %38, %c0_i32_25 : i32
    scf.if %39 {
      %c0_26 = arith.constant 0 : index
      %c0_27 = arith.constant 0 : index
      %40 = vector.load %arg5[%c0_26, %c0_27] : memref<8x128xf32, #tpu.memory_space<vmem>>, vector<8x128xf32>
      %cst_28 = arith.constant dense<0.000000e+00> : vector<8xf32>
      %41 = vector.multi_reduction <add>, %40, %cst_28 [1] : vector<8x128xf32> to vector<8xf32>
      %42 = vector.shape_cast %41 : vector<8xf32> to vector<8x1xf32>
      %cst_29 = arith.constant 1.000000e+00 : f32
      %43 = vector.broadcast %cst_29 : f32 to vector<8x1xf32>
      %44 = arith.addf %42, %43 : vector<8x1xf32>
      %c0_30 = arith.constant 0 : index
      %c0_31 = arith.constant 0 : index
      %45 = vector.load %arg6[%c0_30, %c0_31] : memref<8x128xf32, #tpu.memory_space<vmem>>, vector<8x128xf32>
      %cst_32 = arith.constant dense<0.000000e+00> : vector<8xf32>
      %46 = vector.multi_reduction <add>, %45, %cst_32 [1] : vector<8x128xf32> to vector<8xf32>
      %47 = vector.shape_cast %46 : vector<8xf32> to vector<8x1xf32>
      %cst_33 = arith.constant 1.000000e+00 : f32
      %48 = vector.broadcast %cst_33 : f32 to vector<8x1xf32>
      %49 = arith.addf %47, %48 : vector<8x1xf32>
      %50 = arith.divf %44, %49 : vector<8x1xf32>
      %cst_34 = arith.constant 1.000000e+00 : f32
      %51 = vector.broadcast %cst_34 : f32 to vector<8x1xf32>
      %52 = arith.subf %51, %50 : vector<8x1xf32>
      %c0_35 = arith.constant 0 : index
      %c0_36 = arith.constant 0 : index
      %53 = vector.load %arg4[%c0_35, %c0_36] : memref<8x1xf32, #tpu.memory_space<vmem>>, vector<8x1xf32>
      tpu.vector_store %arg4[%c0_35, %c0_36], %52 {strides = array<i32>} : memref<8x1xf32, #tpu.memory_space<vmem>>, vector<8x1xf32>,
    } else {
    }
    return
  }
  func.func @transform_0(%arg0: i32, %arg1: i32) -> (i32, i32) {
    %c0_i32 = arith.constant 0 : i32
    return %arg0, %arg1 : i32, i32
  }
  func.func @transform_1(%arg0: i32, %arg1: i32) -> (i32, i32) {
    %c0_i32 = arith.constant 0 : i32
    return %arg0, %arg1 : i32, i32
  }
  func.func @transform_2(%arg0: i32, %arg1: i32) -> (i32, i32) {
    %c0_i32 = arith.constant 0 : i32
    %c0_i32_0 = arith.constant 0 : i32
    return %arg0, %c0_i32 : i32, i32
  }
}

</mosaic_0001>

<bundles_post_ra>
// kernel: tpu_custom_call.1
= control target key start
LH: loop header
LB: loop body
LE: loop exit
PB: predicated region body
PF: predicated region fallthrough
CT: control target
= control target key end

     0   :  { %7 = vsyncpa [#allocation5], 0  ;;  %s205_s0 = inlined_call_operand.hbm [shape: f32[8,256], index: 0, kind: input, shape index: {}]   ;;  %s206_s1 = inlined_call_operand.hbm [shape: f32[8,256], index: 1, kind: input, shape index: {}]   ;;  %s207_s2 = inlined_call_operand.vmem [shape: f32[8,1], index: 2, kind: output, shape index: {}]  }
   0x1   :  { %8 = vsyncpa [#allocation7], 0  ;;  %s161_s9 = smov [#allocation4]   ;;  %s162_s11 = smov [#allocation6]  }
   0x2   :  { %s15_s10 = sshll.u32 %s161_s9, 4  ;;  %s25_s12 = sshll.u32 %s162_s11, 4  ;;  %s16_s10 = int_to_ptr.vmem [resolvable:$true] %s15_s10  ;;  %s26_s12 = int_to_ptr.vmem [resolvable:$true] %s25_s12 }
   0x3   :  { %s113_s15 = scalar_lea.hbm %s205_s0, 256 }
   0x4   :  { %p114_p0 = scmp.ne.s32.totalorder %s205_s0, %s113_s15  ;;  %p117_p1 = scmp.lt.u32.totalorder %s113_s15, %s205_s0 }
   0x6   :  { %p119_p2 = pnand %p117_p1, %p114_p0 }
   0x8   :  { %122 = shalt.err (!%p119_p2)
}
   0x9   :  { %s123_s20 = scalar_lea.vmem %s16_s10, 256  ;;  %p128_p4 = scmp.lt.s32.totalorder %s16_s10, %s16_s10 }
   0xa   :  { %p124_p3 = scmp.ne.s32.totalorder %s16_s10, %s123_s20  ;;  %p129_p5 = scmp.lt.s32.totalorder %s123_s20, %s123_s20 }
   0xc   :  { %p130_p6 = por %p129_p5, %p128_p4 }
   0xe   :  { %p131_p7 = pnand %p130_p6, %p124_p3 }
  0x10   :  { %134 = shalt.err (!%p131_p7)
}
  0x11   :  { %18 = dma.hbm_to_vmem [thread:$0]  %s205_s0, 256, %s16_s10, [#allocation5]  }
  0x12   :  { %s135_s25 = scalar_lea.hbm %s206_s1, 256 }
  0x13   :  { %p136_p8 = scmp.ne.s32.totalorder %s206_s1, %s135_s25  ;;  %p139_p9 = scmp.lt.u32.totalorder %s135_s25, %s206_s1 }
  0x15   :  { %p141_p10 = pnand %p139_p9, %p136_p8 }
  0x17   :  { %144 = shalt.err (!%p141_p10)
}
  0x18   :  { %s145_s30 = scalar_lea.vmem %s26_s12, 256  ;;  %p150_p12 = scmp.lt.s32.totalorder %s26_s12, %s26_s12 }
  0x19   :  { %p146_p11 = scmp.ne.s32.totalorder %s26_s12, %s145_s30  ;;  %p151_p13 = scmp.lt.s32.totalorder %s145_s30, %s145_s30 }
  0x1b   :  { %p152_p0 = por %p151_p13, %p150_p12 }
  0x1d   :  { %p153_p1 = pnand %p152_p0, %p146_p11 }
  0x1f   :  { %156 = shalt.err (!%p153_p1)
}
  0x20   :  { %28 = dma.hbm_to_vmem [thread:$0]  %s206_s1, 256, %s26_s12, [#allocation7]  }
  0x21   :  { %157 = dma.done.wait [#allocation5], 256  }
  0x22   :  { %158 = vsyncadd [#allocation5], 4294967040 }
  0x23   :  { %159 = dma.done.wait [#allocation7], 256  }
  0x24   :  { %160 = vsyncadd [#allocation7], 4294967040  ;;  %v41_v0 = vld [vmem:[#allocation4] sm:$0xff]  ;;  %v59_v1 = vld [vmem:[#allocation4 + $0x8] sm:$0xff]  ;;  %vm91_vm0 = vcmask 7168  }
  0x25   :  { %v99_v2 = vmul.f32 -1.442695, %v41_v0  ;;  %v100_v3 = vmul.f32 -1.442695, %v59_v1  ;;  %v48_v8 = vld [vmem:[#allocation6] sm:$0xff]  ;;  %v66_v9 = vld [vmem:[#allocation6 + $0x8] sm:$0xff] }
  0x26   :  { %v55_v10 = vmul.f32 %v48_v8, %v48_v8  ;;  %v73_v12 = vmul.f32 %v66_v9, %v66_v9 }
  0x27   :  { %103 = vpow2.f32 %v99_v2 }
  0x28   :  { %105 = vpow2.f32 %v100_v3 }
  0x31   :  { %v104_v4 = vpop.eup %103 }
  0x32   :  { %v106_v5 = vpop.eup %105  ;;  %v45_v6 = vadd.f32 1.0, %v104_v4 }
  0x33   :  { %v63_v7 = vadd.f32 1.0, %v106_v5 }
  0x34   :  { %107 = vrcp.f32 %v45_v6 }
  0x35   :  { %109 = vrcp.f32 %v63_v7 }
  0x3e   :  { %v108_v11 = vpop.eup %107 }
  0x3f   :  { %v110_v13 = vpop.eup %109  ;;  %v54_v14 = vmul.f32 %v108_v11, %v108_v11  ;;  %v50_v18 = vmul.f32 %v108_v11, %v48_v8 }
  0x40   :  { %v72_v15 = vmul.f32 %v110_v13, %v110_v13  ;;  %v68_v19 = vmul.f32 %v110_v13, %v66_v9 }
  0x41   :  { %v56_v16 = vadd.f32 %v55_v10, %v54_v14 }
  0x42   :  { %v74_v17 = vadd.f32 %v73_v12, %v72_v15  ;;  %v69_v21 = vadd.f32 %v68_v19, %v50_v18 }
  0x44   :  { %v75_v20 = vadd.f32 %v74_v17, %v56_v16 }
  0x46   :  { %85 = vadd.xlane.f32.xlu0 %v75_v20 }
  0x4a   :  { %81 = vadd.xlane.f32.xlu0 %v69_v21 }
  0xd3   :  { %v86_v22 = vpop.xlane.xlu0 %85 }
  0xd4   :  { %v87_v23 = vadd.f32 1.0, %v86_v22 }
  0xd6   :  { %111 = vrcp.f32 %v87_v23 }
  0xd7   :  { %v82_v24 = vpop.xlane.xlu0 %81 }
  0xd8   :  { %v83_v25 = vadd.f32 1.0, %v82_v24 }
  0xe0   :  { %v112_v26 = vpop.eup %111 }
  0xe1   :  { %v89_v27 = vmul.f32 %v112_v26, %v83_v25 }
  0xe3   :  { %v90_v28 = vsub.f32 1.0, %v89_v27 }
  0xe5   :  { %92 = vst.msk [vmem:[%s207_s2] sm:$0xff] %vm91_vm0, %v90_v28 }
  0xe6   :  { %97 = vsyncpa [#allocation5], 1 }
  0xe7   :  { %98 = vsyncpa [#allocation7], 1 }

</bundles_post_ra>
